<compile_context>
chip_gen: v6e
topology: v6e:2x2x1
jax: 0.10.0
libtpu: 0.0.40
codegen_flags: <defaults>
</compile_context>

<pallas_src>
import functools

import jax
import jax.numpy as jnp
from jax import lax
from jax.experimental import pallas as pl
from jax.experimental.pallas import tpu as pltpu


def _round_up(x, m):
    return (x + m - 1) // m * m


def bpnet_kernel(x_ref, w1_ref, b1_ref, w2_ref, b2_ref, w3_ref, b3_ref,
                 w4_ref, b4_ref, o_ref):
    # x tile arrives in its native (TB, D) f32 layout; cast to bf16 on-chip.
    x = x_ref[...].astype(jnp.bfloat16)                                   # (TB, D)

    # Layer 1: (128, D) x (TB, D)^T -> (128, TB). trans_b contraction keeps the batch
    # on the lane axis; f32 accumulation on the MXU.
    h1 = lax.dot_general(w1_ref[...], x, (((1,), (1,)), ((), ())),
                         preferred_element_type=jnp.float32)
    h1 = jnp.maximum(h1.astype(jnp.bfloat16) + b1_ref[...], 0)           # bf16 VALU chain

    # Layer 2: (32, 128) @ (128, TB) -> (32, TB), bf16 operands, f32 accumulation.
    h2 = jnp.dot(w2_ref[...], h1, preferred_element_type=jnp.float32)
    h2 = jnp.maximum(h2.astype(jnp.bfloat16) + b2_ref[...], 0)

    # Layer 3 (rows zero-padded 2 -> 8, bf16 operands): (8, 32) @ (32, TB) -> (8, TB).
    h3 = jnp.dot(w3_ref[...], h2, preferred_element_type=jnp.float32) + b3_ref[...]
    h3 = jnp.maximum(h3, 0.0)        # padded rows have zero weight & bias -> stay 0

    # Layer 4 (weights zero-padded to an (8, 1) column): VPU multiply + sublane reduce.
    h4 = jnp.sum(w4_ref[...] * h3, axis=0, keepdims=True) + b4_ref[...]   # (1, TB)

    # Sigmoid: exp and approx reciprocal both ride the EUP slot; output is lane-dense.
    o_ref[...] = pl.reciprocal(1.0 + jnp.exp(-h4), approx=True).astype(o_ref.dtype)


@functools.partial(jax.jit, static_argnames=("tile_b",))
def bpnet_forward(x, params, *, tile_b=2048):
    """x: (B, input_dim) f32. params: PyTorch-layout weights (out, in) / biases (out,)."""
    B, D = x.shape

    if tile_b % 128 != 0:
        raise ValueError(f"tile_b must be a multiple of 128, got {tile_b}")

    # Tile: default 2048 to amortize per-grid-step overhead; cap at half the rounded
    # batch so mid-size batches still produce >= 2 grid steps (v7x dual TensorCore).
    B_ru = _round_up(B, 128)
    TB = min(tile_b, max(128, _round_up(B_ru // 2, 128)))
    B_pad = _round_up(B, TB)
    n_tiles = B_pad // TB

    # Only a (possibly zero-width) pad happens in the wrapper; x stays f32, untransposed.
    x_pad = jnp.pad(x, ((0, B_pad - B), (0, 0)))

    # Weights in PyTorch (out, in) layout; tiny layers zero-padded to sublane width 8.
    w1 = params["w1"].astype(jnp.bfloat16)                                # (128, D)
    b1 = params["b1"].reshape(128, 1).astype(jnp.bfloat16)
    w2 = params["w2"].astype(jnp.bfloat16)                                # (32, 128)
    b2 = params["b2"].reshape(32, 1).astype(jnp.bfloat16)
    w3 = jnp.zeros((8, 32), jnp.bfloat16).at[:2, :].set(
        params["w3"].astype(jnp.bfloat16))                                # (2,32) -> (8,32)
    b3 = jnp.zeros((8, 1), jnp.float32).at[:2, 0].set(params["b3"])
    w4 = jnp.zeros((8, 1), jnp.float32).at[:2, 0].set(params["w4"][0, :])  # (1,2) -> (8,1)
    b4 = params["b4"].reshape(1, 1).astype(jnp.float32)

    def full_spec(shape):
        return pl.BlockSpec(shape, lambda i: (0,) * len(shape))

    out = pl.pallas_call(
        bpnet_kernel,
        out_shape=jax.ShapeDtypeStruct((1, B_pad), jnp.float32),
        grid=(n_tiles,),
        in_specs=[
            pl.BlockSpec((TB, D), lambda i: (i, 0)),     # native-layout x tile, dbl-buffered
            full_spec(w1.shape), full_spec(b1.shape),
            full_spec(w2.shape), full_spec(b2.shape),
            full_spec(w3.shape), full_spec(b3.shape),
            full_spec(w4.shape), full_spec(b4.shape),
        ],
        out_specs=pl.BlockSpec((1, TB), lambda i: (0, i)),   # lane-dense output row
        compiler_params=pltpu.CompilerParams(
            dimension_semantics=("parallel",),
            vmem_limit_bytes=32 * 1024 * 1024,   # big tiles stay safe on v5e's 16 MiB default
        ),
    )(x_pad, w1, b1, w2, b2, w3, b3, w4, b4)

    return out[0, :B].reshape(B, 1).astype(jnp.float32)


def init_params(key, input_dim):
    """Deterministic init matching nn.Linear shapes: W (out, in), b (out,)."""
    ks = jax.random.split(key, 8)

    def lin(kw, kb, fan_in, fan_out):
        bound = 1.0 / jnp.sqrt(jnp.float32(fan_in))
        w = jax.random.uniform(kw, (fan_out, fan_in), jnp.float32, -bound, bound)
        b = jax.random.uniform(kb, (fan_out,), jnp.float32, -bound, bound)
        return w, b

    w1, b1 = lin(ks[0], ks[1], input_dim, 128)
    w2, b2 = lin(ks[2], ks[3], 128, 32)
    w3, b3 = lin(ks[4], ks[5], 32, 2)
    w4, b4 = lin(ks[6], ks[7], 2, 1)
    return dict(w1=w1, b1=b1, w2=w2, b2=b2, w3=w3, b3=b3, w4=w4, b4=b4)


def bpnet_reference(x, p):
    h = jnp.maximum(x @ p["w1"].T + p["b1"], 0.0)
    h = jnp.maximum(h @ p["w2"].T + p["b2"], 0.0)
    h = jnp.maximum(h @ p["w3"].T + p["b3"], 0.0)
    return jax.nn.sigmoid(h @ p["w4"].T + p["b4"])


if __name__ == "__main__":
    key = jax.random.PRNGKey(0)
    k_x, k_p = jax.random.split(key)

    batch, input_dim = 8, 32
    x = jax.random.normal(k_x, (batch, input_dim), jnp.float32)
    params = init_params(k_p, input_dim)

    out = bpnet_forward(x, params)
    out = jax.block_until_ready(out)

    ref = bpnet_reference(x, params)
    assert out.shape == (batch, 1)
    # bf16 matmul operands / bias+ReLU chains + approx reciprocal vs. pure-f32
    # reference: sigmoid outputs live in [0, 1], so 2e-2 covers the bf16 rounding.
    # Note: approx reciprocal may push outputs marginally outside [0, 1].
    assert jnp.allclose(out, ref, atol=2e-2, rtol=2e-2), float(jnp.max(jnp.abs(out - ref)))

    print("KERNEL_OK")
</pallas_src>

<mosaic_0001>
module attributes {stable_mosaic.version = 11 : i64} {
  func.func @bpnet_kernel(%arg0: i32, %arg1: memref<128x32xf32, #tpu.memory_space<vmem>>, %arg2: memref<128x32xbf16, #tpu.memory_space<vmem>>, %arg3: memref<128x1xbf16, #tpu.memory_space<vmem>>, %arg4: memref<32x128xbf16, #tpu.memory_space<vmem>>, %arg5: memref<32x1xbf16, #tpu.memory_space<vmem>>, %arg6: memref<8x32xbf16, #tpu.memory_space<vmem>>, %arg7: memref<8x1xf32, #tpu.memory_space<vmem>>, %arg8: memref<8x1xf32, #tpu.memory_space<vmem>>, %arg9: memref<1x1xf32, #tpu.memory_space<vmem>>, %arg10: memref<1x128xf32, #tpu.memory_space<vmem>>) attributes {dimension_semantics = [#tpu.dimension_semantics<parallel>], iteration_bounds = array<i64: 1>, scalar_prefetch = 0 : i64, scratch_operands = 0 : i64, tpu.core_type = #tpu.core_type<tc>, window_params = [{transform_indices = @transform_0, window_bounds = array<i64: 128, 32>}, {pipeline_mode = #tpu.pipeline_mode<synchronous>, transform_indices = @transform_1, window_bounds = array<i64: 128, 32>}, {pipeline_mode = #tpu.pipeline_mode<synchronous>, transform_indices = @transform_2, window_bounds = array<i64: 128, 1>}, {pipeline_mode = #tpu.pipeline_mode<synchronous>, transform_indices = @transform_3, window_bounds = array<i64: 32, 128>}, {pipeline_mode = #tpu.pipeline_mode<synchronous>, transform_indices = @transform_4, window_bounds = array<i64: 32, 1>}, {pipeline_mode = #tpu.pipeline_mode<synchronous>, transform_indices = @transform_5, window_bounds = array<i64: 8, 32>}, {pipeline_mode = #tpu.pipeline_mode<synchronous>, transform_indices = @transform_6, window_bounds = array<i64: 8, 1>}, {pipeline_mode = #tpu.pipeline_mode<synchronous>, transform_indices = @transform_7, window_bounds = array<i64: 8, 1>}, {pipeline_mode = #tpu.pipeline_mode<synchronous>, transform_indices = @transform_8, window_bounds = array<i64: 1, 1>}, {transform_indices = @transform_9, window_bounds = array<i64: 1, 128>}]} {
    %c0 = arith.constant 0 : index
    %c0_0 = arith.constant 0 : index
    %0 = vector.load %arg1[%c0, %c0_0] : memref<128x32xf32, #tpu.memory_space<vmem>>, vector<128x32xf32>
    %1 = arith.truncf %0 : vector<128x32xf32> to vector<128x32xbf16>
    %c0_1 = arith.constant 0 : index
    %c0_2 = arith.constant 0 : index
    %2 = vector.load %arg2[%c0_1, %c0_2] : memref<128x32xbf16, #tpu.memory_space<vmem>>, vector<128x32xbf16>
    %cst = arith.constant dense<0.000000e+00> : vector<128x128xf32>
    %3 = tpu.matmul %2, %1, %cst {dimension_numbers = #tpu.dot_dimension_numbers<[1], [1], [0], [0], [0, 0, 1, 0], [], []>} : vector<128x32xbf16>, vector<128x32xbf16>, vector<128x128xf32> -> vector<128x128xf32>
    %4 = arith.truncf %3 : vector<128x128xf32> to vector<128x128xbf16>
    %c0_3 = arith.constant 0 : index
    %c0_4 = arith.constant 0 : index
    %5 = vector.load %arg3[%c0_3, %c0_4] : memref<128x1xbf16, #tpu.memory_space<vmem>>, vector<128x1xbf16>
    %6 = vector.broadcast %5 : vector<128x1xbf16> to vector<128x128xbf16>
    %7 = arith.addf %4, %6 : vector<128x128xbf16>
    %cst_5 = arith.constant 0.000000e+00 : bf16
    %8 = vector.broadcast %cst_5 : bf16 to vector<128x128xbf16>
    %9 = arith.maximumf %7, %8 : vector<128x128xbf16>
    %c0_6 = arith.constant 0 : index
    %c0_7 = arith.constant 0 : index
    %10 = vector.load %arg4[%c0_6, %c0_7] : memref<32x128xbf16, #tpu.memory_space<vmem>>, vector<32x128xbf16>
    %cst_8 = arith.constant dense<0.000000e+00> : vector<32x128xf32>
    %11 = tpu.matmul %10, %9, %cst_8 {dimension_numbers = #tpu.dot_dimension_numbers<[1], [0], [0], [1], [0, 0, 1, 1], [], []>} : vector<32x128xbf16>, vector<128x128xbf16>, vector<32x128xf32> -> vector<32x128xf32>
    %12 = arith.truncf %11 : vector<32x128xf32> to vector<32x128xbf16>
    %c0_9 = arith.constant 0 : index
    %c0_10 = arith.constant 0 : index
    %13 = vector.load %arg5[%c0_9, %c0_10] : memref<32x1xbf16, #tpu.memory_space<vmem>>, vector<32x1xbf16>
    %14 = vector.broadcast %13 : vector<32x1xbf16> to vector<32x128xbf16>
    %15 = arith.addf %12, %14 : vector<32x128xbf16>
    %cst_11 = arith.constant 0.000000e+00 : bf16
    %16 = vector.broadcast %cst_11 : bf16 to vector<32x128xbf16>
    %17 = arith.maximumf %15, %16 : vector<32x128xbf16>
    %c0_12 = arith.constant 0 : index
    %c0_13 = arith.constant 0 : index
    %18 = vector.load %arg6[%c0_12, %c0_13] : memref<8x32xbf16, #tpu.memory_space<vmem>>, vector<8x32xbf16>
    %cst_14 = arith.constant dense<0.000000e+00> : vector<8x128xf32>
    %19 = tpu.matmul %18, %17, %cst_14 {dimension_numbers = #tpu.dot_dimension_numbers<[1], [0], [0], [1], [0, 0, 1, 1], [], []>} : vector<8x32xbf16>, vector<32x128xbf16>, vector<8x128xf32> -> vector<8x128xf32>
    %c0_15 = arith.constant 0 : index
    %c0_16 = arith.constant 0 : index
    %20 = vector.load %arg7[%c0_15, %c0_16] : memref<8x1xf32, #tpu.memory_space<vmem>>, vector<8x1xf32>
    %21 = vector.broadcast %20 : vector<8x1xf32> to vector<8x128xf32>
    %22 = arith.addf %19, %21 : vector<8x128xf32>
    %cst_17 = arith.constant 0.000000e+00 : f32
    %23 = vector.broadcast %cst_17 : f32 to vector<8x128xf32>
    %24 = arith.maximumf %22, %23 : vector<8x128xf32>
    %c0_18 = arith.constant 0 : index
    %c0_19 = arith.constant 0 : index
    %25 = vector.load %arg8[%c0_18, %c0_19] : memref<8x1xf32, #tpu.memory_space<vmem>>, vector<8x1xf32>
    %26 = vector.broadcast %25 : vector<8x1xf32> to vector<8x128xf32>
    %27 = arith.mulf %26, %24 : vector<8x128xf32>
    %cst_20 = arith.constant dense<0.000000e+00> : vector<128xf32>
    %28 = vector.multi_reduction <add>, %27, %cst_20 [0] : vector<8x128xf32> to vector<128xf32>
    %29 = vector.shape_cast %28 : vector<128xf32> to vector<1x128xf32>
    %c0_21 = arith.constant 0 : index
    %c0_22 = arith.constant 0 : index
    %30 = vector.load %arg9[%c0_21, %c0_22] : memref<1x1xf32, #tpu.memory_space<vmem>>, vector<1x1xf32>
    %31 = vector.broadcast %30 : vector<1x1xf32> to vector<1x128xf32>
    %32 = arith.addf %29, %31 : vector<1x128xf32>
    %cst_23 = arith.constant 0.000000e+00 : f32
    %33 = vector.broadcast %cst_23 : f32 to vector<1x128xf32>
    %34 = arith.subf %33, %32 : vector<1x128xf32>
    %35 = math.exp %34 : vector<1x128xf32>
    %cst_24 = arith.constant 1.000000e+00 : f32
    %36 = vector.broadcast %cst_24 : f32 to vector<1x128xf32>
    %37 = arith.addf %36, %35 : vector<1x128xf32>
    %38 = tpu.reciprocal %37 {approx = true} : vector<1x128xf32> -> vector<1x128xf32>
    %c0_25 = arith.constant 0 : index
    %c0_26 = arith.constant 0 : index
    %39 = vector.load %arg10[%c0_25, %c0_26] : memref<1x128xf32, #tpu.memory_space<vmem>>, vector<1x128xf32>
    tpu.vector_store %arg10[%c0_25, %c0_26], %38 {strides = array<i32>} : memref<1x128xf32, #tpu.memory_space<vmem>>, vector<1x128xf32>,
    return
  }
  func.func @transform_0(%arg0: i32) -> (i32, i32) {
    %c0_i32 = arith.constant 0 : i32
    %c0_i32_0 = arith.constant 0 : i32
    return %arg0, %c0_i32 : i32, i32
  }
  func.func @transform_1(%arg0: i32) -> (i32, i32) {
    %c0_i32 = arith.constant 0 : i32
    %c0_i32_0 = arith.constant 0 : i32
    %c0_i32_1 = arith.constant 0 : i32
    return %c0_i32, %c0_i32_0 : i32, i32
  }
  func.func @transform_2(%arg0: i32) -> (i32, i32) {
    %c0_i32 = arith.constant 0 : i32
    %c0_i32_0 = arith.constant 0 : i32
    %c0_i32_1 = arith.constant 0 : i32
    return %c0_i32, %c0_i32_0 : i32, i32
  }
  func.func @transform_3(%arg0: i32) -> (i32, i32) {
    %c0_i32 = arith.constant 0 : i32
    %c0_i32_0 = arith.constant 0 : i32
    %c0_i32_1 = arith.constant 0 : i32
    return %c0_i32, %c0_i32_0 : i32, i32
  }
  func.func @transform_4(%arg0: i32) -> (i32, i32) {
    %c0_i32 = arith.constant 0 : i32
    %c0_i32_0 = arith.constant 0 : i32
    %c0_i32_1 = arith.constant 0 : i32
    return %c0_i32, %c0_i32_0 : i32, i32
  }
  func.func @transform_5(%arg0: i32) -> (i32, i32) {
    %c0_i32 = arith.constant 0 : i32
    %c0_i32_0 = arith.constant 0 : i32
    %c0_i32_1 = arith.constant 0 : i32
    return %c0_i32, %c0_i32_0 : i32, i32
  }
  func.func @transform_6(%arg0: i32) -> (i32, i32) {
    %c0_i32 = arith.constant 0 : i32
    %c0_i32_0 = arith.constant 0 : i32
    %c0_i32_1 = arith.constant 0 : i32
    return %c0_i32, %c0_i32_0 : i32, i32
  }
  func.func @transform_7(%arg0: i32) -> (i32, i32) {
    %c0_i32 = arith.constant 0 : i32
    %c0_i32_0 = arith.constant 0 : i32
    %c0_i32_1 = arith.constant 0 : i32
    return %c0_i32, %c0_i32_0 : i32, i32
  }
  func.func @transform_8(%arg0: i32) -> (i32, i32) {
    %c0_i32 = arith.constant 0 : i32
    %c0_i32_0 = arith.constant 0 : i32
    %c0_i32_1 = arith.constant 0 : i32
    return %c0_i32, %c0_i32_0 : i32, i32
  }
  func.func @transform_9(%arg0: i32) -> (i32, i32) {
    %c0_i32 = arith.constant 0 : i32
    %c0_i32_0 = arith.constant 0 : i32
    return %c0_i32, %arg0 : i32, i32
  }
}

</mosaic_0001>

<bundles_post_ra>
// kernel: bpnet_forward.1
= control target key start
LH: loop header
LB: loop body
LE: loop exit
PB: predicated region body
PF: predicated region fallthrough
CT: control target
= control target key end

     0   :  { %vm115_vm0 = vcmask 261120   ;;  %v907_v3 = vmov 0   ;;  %vm910_vm1 = vmmov 0   ;;  %s1201_s0 = inlined_call_operand.vmem [shape: f32[128,32], index: 0, kind: input, shape index: {}]   ;;  %s1202_s8 = inlined_call_operand.<no memory space> [shape: f32[1,1], index: 8, kind: input, shape index: {}]   ;;  %s1203_s1 = inlined_call_operand.vmem [shape: bf16[128,32], index: 1, kind: input, shape index: {}]   ;;  %s1204_s2 = inlined_call_operand.vmem [shape: bf16[128,1], index: 2, kind: input, shape index: {}]   ;;  %s1205_s4 = inlined_call_operand.vmem [shape: bf16[32,1], index: 4, kind: input, shape index: {}]   ;;  %s1206_s6 = inlined_call_operand.vmem [shape: f32[8,1], index: 6, kind: input, shape index: {}]   ;;  %s1207_s7 = inlined_call_operand.vmem [shape: f32[8,1], index: 7, kind: input, shape index: {}]   ;;  %s1208_s3 = inlined_call_operand.vmem [shape: bf16[32,128], index: 3, kind: input, shape index: {}]   ;;  %s1209_s5 = inlined_call_operand.vmem [shape: bf16[8,32], index: 5, kind: input, shape index: {}]   ;;  %s1210_s9 = inlined_call_operand.vmem [shape: f32[1,128], index: 9, kind: output, shape index: {}]  }
   0x1   :  { %v49_v0 = vld [vmem:[%s1201_s0 + $0x70] sm:$0xff]  ;;  %v50_v1 = vld [vmem:[%s1201_s0 + $0x78] sm:$0xff]  ;;  %v47_v2 = vld [vmem:[%s1201_s0 + $0x60] sm:$0xff]  ;;  %892 = vset.pattern.permute.xlu1 %v907_v3  ;;  %891 = vset.pattern.permute.xlu0 %v907_v3  ;;  %v14_v4 = vstv %s1202_s8 }
   0x2   :  { %v58_v5 = vpack.c.bf16 %v50_v1, %v49_v0  ;;  %v48_v6 = vld [vmem:[%s1201_s0 + $0x68] sm:$0xff]  ;;  %15 = vst [vmem:[#allocation2] sm:$0x1] %v14_v4  ;;  %v45_v9 = vld [vmem:[%s1201_s0 + $0x50] sm:$0xff]  ;;  %v46_v10 = vld [vmem:[%s1201_s0 + $0x58] sm:$0xff] }
   0x3   :  { %v57_v7 = vpack.c.bf16 %v48_v6, %v47_v2  ;;  %v893_v11 = vld [vmem:[%s1203_s1] sm:$0xff]   ;;  %v56_v13 = vpack.c.bf16 %v46_v10, %v45_v9  ;;  %v283_v14 = vld [vmem:[%s1204_s2 + $0x38] sm:$0xf]  ;;  %v281_v15 = vld [vmem:[%s1204_s2 + $0x30] sm:$0xf] }
   0x4   :  { %879 = vmatprep.subr.msk.bf16.mxu0 %vm115_vm0, %v58_v5  ;;  %v162_v8 = vsel %vm115_vm0, %v58_v5, 0  ;;  %835 = vmatprep.mubr.msk.bf16.mxu0 %vm115_vm0, %v893_v11  ;;  %v43_v16 = vld [vmem:[%s1201_s0 + $0x40] sm:$0xff]  ;;  %v44_v17 = vld [vmem:[%s1201_s0 + $0x48] sm:$0xff]  ;;  %v284_v18 = vld [vmem:[%s1204_s2 + $0x3c] sm:$0xf] }
   0x5   :  { %820 = vmatpush3.bf16.xpose.msra.mxu0 %v162_v8  ;;  %v159_v12 = vsel %vm115_vm0, %v57_v7, 0  ;;  %455 = vperm.xlu0 %891, %v283_v14   ;;  %v282_v19 = vld [vmem:[%s1204_s2 + $0x34] sm:$0xf]  ;;  %v156_v20 = vsel %vm115_vm0, %v56_v13, 0  ;;  %v55_v21 = vpack.c.bf16 %v44_v17, %v43_v16  ;;  %v280_v22 = vld [vmem:[%s1204_s2 + $0x2c] sm:$0xf] }
   0x6   :  { %880 = vmatprep.subr.msk.bf16.mxu0 %vm115_vm0, %v57_v7  ;;  %431 = vperm.xlu1 %892, %v281_v15   ;;  %v279_v23 = vld [vmem:[%s1204_s2 + $0x28] sm:$0xf]  ;;  %v41_v24 = vld [vmem:[%s1201_s0 + $0x30] sm:$0xff]  ;;  %v42_v25 = vld [vmem:[%s1201_s0 + $0x38] sm:$0xff]  ;;  %v908_v17 = vmov 839922192  }
   0x7   :  { %v278_v26 = vld [vmem:[%s1204_s2 + $0x24] sm:$0xf]  ;;  %v277_v27 = vld [vmem:[%s1204_s2 + $0x20] sm:$0xf]  ;;  %v153_v28 = vsel %vm115_vm0, %v55_v21, 0  ;;  %v54_v29 = vpack.c.bf16 %v42_v25, %v41_v24  ;;  %v40_v33 = vld [vmem:[%s1201_s0 + $0x28] sm:$0xff] }
   0x8   :  { %v276_v30 = vld [vmem:[%s1204_s2 + $0x1c] sm:$0xf]  ;;  %v275_v31 = vld [vmem:[%s1204_s2 + $0x18] sm:$0xf]  ;;  %v39_v32 = vld [vmem:[%s1201_s0 + $0x20] sm:$0xff] }
   0x9   :  { %467 = vperm.xlu0 %891, %v284_v18   ;;  %v274_v34 = vld [vmem:[%s1204_s2 + $0x14] sm:$0xf]  ;;  %v273_v35 = vld [vmem:[%s1204_s2 + $0x10] sm:$0xf]  ;;  %v150_v36 = vsel %vm115_vm0, %v54_v29, 0  ;;  %v53_v37 = vpack.c.bf16 %v40_v33, %v39_v32  ;;  %v38_v41 = vld [vmem:[%s1201_s0 + $0x18] sm:$0xff]  ;;  %v291_v18 = vunpack.c.l.s4 %v908_v17 }
   0xa   :  { %443 = vperm.xlu1 %892, %v282_v19   ;;  %v272_v38 = vld [vmem:[%s1204_s2 + $0xc] sm:$0xf]  ;;  %v271_v39 = vld [vmem:[%s1204_s2 + $0x8] sm:$0xf]  ;;  %v37_v40 = vld [vmem:[%s1201_s0 + $0x10] sm:$0xff]  ;;  %v293_v19 = vlaneseq }
   0xb   :  { %v270_v42 = vld [vmem:[%s1204_s2 + $0x4] sm:$0xf]  ;;  %v269_v43 = vld [vmem:[%s1204_s2] sm:$0xf]  ;;  %v147_v44 = vsel %vm115_vm0, %v53_v37, 0  ;;  %v52_v45 = vpack.c.bf16 %v38_v41, %v37_v40  ;;  %v36_v49 = vld [vmem:[%s1201_s0 + $0x8] sm:$0xff] }
   0xc   :  { %v610_v46 = vld [vmem:[%s1205_s4 + $0x8] sm:$0xf]  ;;  %v611_v47 = vld [vmem:[%s1205_s4 + $0xc] sm:$0xf]  ;;  %v35_v48 = vld [vmem:[%s1201_s0] sm:$0xff] }
   0xd   :  { %822 = vmatpush3.bf16.xpose.msra.mxu0 %v159_v12  ;;  %407 = vperm.xlu0 %891, %v279_v23   ;;  %v608_v50 = vld [vmem:[%s1205_s4] sm:$0xf]  ;;  %v609_v51 = vld [vmem:[%s1205_s4 + $0x4] sm:$0xf]  ;;  %v144_v52 = vsel %vm115_vm0, %v52_v45, 0  ;;  %v51_v53 = vpack.c.bf16 %v36_v49, %v35_v48  ;;  %v894_v58 = vld [vmem:[%s1203_s1 + $0x8] sm:$0xff]  }
   0xe   :  { %881 = vmatprep.subr.msk.bf16.mxu0 %vm115_vm0, %v56_v13  ;;  %419 = vperm.xlu1 %892, %v280_v22   ;;  %v677_v54 = vld [vmem:[%s1206_s6] sm:$0xff]  ;;  %v895_v59 = vld [vmem:[%s1203_s1 + $0x10] sm:$0xff]   ;;  %v896_v60 = vld [vmem:[%s1203_s1 + $0x18] sm:$0xff]   ;;  %v292_v22 = vunpack.c.0.s8 %v291_v18  ;;  %v1147_v23 = vshrl.u32 %v293_v19, 7 }
   0xf   :  { %v727_v55 = vld [vmem:[%s1207_s7] sm:$0xff]  ;;  %v141_v57 = vsel %vm115_vm0, %v51_v53, 0  ;;  %v898_v62 = vld [vmem:[%s1203_s1 + $0x28] sm:$0xff]   ;;  %v899_v63 = vld [vmem:[%s1203_s1 + $0x30] sm:$0xff]  }
  0x10   :  { %v740_v56 = vld [vmem:[#allocation2] sm:$0x1]  ;;  %v900_v0 = vld [vmem:[%s1203_s1 + $0x38] sm:$0xff]  }
  0x11   :  { %383 = vperm.xlu0 %891, %v277_v27   ;;  %v897_v61 = vld [vmem:[%s1203_s1 + $0x20] sm:$0xff]  }
  0x12   :  { %395 = vperm.xlu1 %892, %v278_v26   ;;  %v901_v1 = vld [vmem:[%s1208_s3] sm:$0xff]  }
  0x13   :  { %867 = vmatprep.mubr.bf16.mxu1 %v901_v1 }
  0x15   :  { %824 = vmatpush3.bf16.xpose.msra.mxu0 %v156_v20  ;;  %359 = vperm.xlu0 %891, %v275_v31  }
  0x16   :  { %882 = vmatprep.subr.msk.bf16.mxu0 %vm115_vm0, %v55_v21  ;;  %371 = vperm.xlu1 %892, %v276_v30  }
  0x19   :  { %335 = vperm.xlu0 %891, %v273_v35  }
  0x1a   :  { %347 = vperm.xlu1 %892, %v274_v34  }
  0x1d   :  { %826 = vmatpush3.bf16.xpose.msra.mxu0 %v153_v28  ;;  %311 = vperm.xlu0 %891, %v271_v39   ;;  %v1150_v28 = vsub.s32 %v292_v22, %v1147_v23 }
  0x1e   :  { %883 = vmatprep.subr.msk.bf16.mxu0 %vm115_vm0, %v54_v29  ;;  %323 = vperm.xlu1 %892, %v272_v38  }
  0x21   :  { %287 = vperm.xlu0 %891, %v269_v43  }
  0x22   :  { %299 = vperm.xlu1 %892, %v270_v42  }
  0x25   :  { %828 = vmatpush3.bf16.xpose.msra.mxu0 %v150_v36  ;;  %638 = vperm.xlu0 %891, %v610_v46  }
  0x26   :  { %884 = vmatprep.subr.msk.bf16.mxu0 %vm115_vm0, %v53_v37  ;;  %650 = vperm.xlu1 %892, %v611_v47  }
  0x29   :  { %614 = vperm.xlu0 %891, %v608_v50  }
  0x2a   :  { %626 = vperm.xlu1 %892, %v609_v51  }
  0x2d   :  { %830 = vmatpush3.bf16.xpose.msra.mxu0 %v147_v44  ;;  %680 = vperm.xlu0 %891, %v677_v54  }
  0x2e   :  { %885 = vmatprep.subr.msk.bf16.mxu0 %vm115_vm0, %v52_v45  ;;  %730 = vperm.xlu1 %892, %v727_v55  }
  0x31   :  { %743 = vperm.xlu0 %891, %v740_v56  }
  0x35   :  { %832 = vmatpush3.bf16.xpose.msra.mxu0 %v144_v52 }
  0x36   :  { %886 = vmatprep.subr.msk.bf16.mxu0 %vm115_vm0, %v51_v53 }
  0x3d   :  { %834 = vmatpush3.bf16.xpose.msra.mxu0 %v141_v57 }
  0x44   :  { %836 = vmatmul.mubr.msk.bf16.vlgmr.msra.gmra.mxu0 %vm115_vm0, %v894_v58 }
  0x45   :  { %839 = vmatprep.mubr.msk.bf16.mxu0 %vm115_vm0, %v895_v59 }
  0x4c   :  { %840 = vmatmul.mubr.msk.bf16.gmra.mxu0 %vm115_vm0, %v896_v60 }
  0x4d   :  { %843 = vmatprep.mubr.msk.bf16.mxu0 %vm115_vm0, %v897_v61 }
  0x54   :  { %844 = vmatmul.mubr.msk.bf16.gmra.mxu0 %vm115_vm0, %v898_v62 }
  0x55   :  { %847 = vmatprep.mubr.msk.bf16.mxu0 %vm115_vm0, %v899_v63 }
  0x5c   :  { %848 = vmatmul.mubr.msk.bf16.gmra.mxu0 %vm115_vm0, %v900_v0 }
  0x80   :  { %v456_v5 = vpop.permute.xlu0 %455 }
  0x81   :  { %v432_v4 = vpop.permute.xlu1 %431  ;;  %v464_v30 = vrot.slane %v456_v5, %v1150_v28 }
  0x82   :  { %v440_v33 = vrot.slane %v432_v4, %v1150_v28 }
  0x84   :  { %v468_v10 = vpop.permute.xlu0 %467 }
  0x85   :  { %v444_v9 = vpop.permute.xlu1 %443  ;;  %v476_v31 = vrot.slane %v468_v10, %v1150_v28 }
  0x86   :  { %v452_v34 = vrot.slane %v444_v9, %v1150_v28 }
  0x87   :  { %v784_v40 = vcombine.low %v464_v30, %v476_v31 }
  0x88   :  { %v408_v15 = vpop.permute.xlu0 %407  ;;  %v783_v42 = vcombine.low %v440_v33, %v452_v34 }
  0x89   :  { %v420_v14 = vpop.permute.xlu1 %419  ;;  %v416_v36 = vrot.slane %v408_v15, %v1150_v28 }
  0x8a   :  { %v428_v35 = vrot.slane %v420_v14, %v1150_v28 }
  0x8c   :  { %v384_v25 = vpop.permute.xlu0 %383  ;;  %v782_v43 = vcombine.low %v416_v36, %v428_v35 }
  0x8d   :  { %v396_v24 = vpop.permute.xlu1 %395  ;;  %v392_v46 = vrot.slane %v384_v25, %v1150_v28 }
  0x8e   :  { %v404_v44 = vrot.slane %v396_v24, %v1150_v28 }
  0x90   :  { %v360_v37 = vpop.permute.xlu0 %359  ;;  %v781_v56 = vcombine.low %v392_v46, %v404_v44 }
  0x91   :  { %v372_v32 = vpop.permute.xlu1 %371  ;;  %v368_v55 = vrot.slane %v360_v37, %v1150_v28 }
  0x92   :  { %v380_v54 = vrot.slane %v372_v32, %v1150_v28 }
  0x94   :  { %v336_v51 = vpop.permute.xlu0 %335  ;;  %v780_v61 = vcombine.low %v368_v55, %v380_v54 }
  0x95   :  { %v348_v47 = vpop.permute.xlu1 %347  ;;  %v344_v0 = vrot.slane %v336_v51, %v1150_v28 }
  0x96   :  { %v356_v62 = vrot.slane %v348_v47, %v1150_v28 }
  0x98   :  { %v312_v63 = vpop.permute.xlu0 %311  ;;  %v779_v14 = vcombine.low %v344_v0, %v356_v62 }
  0x99   :  { %v324_v60 = vpop.permute.xlu1 %323  ;;  %v320_v10 = vrot.slane %v312_v63, %v1150_v28 }
  0x9a   :  { %v332_v9 = vrot.slane %v324_v60, %v1150_v28 }
  0x9d   :  { %v300_v15 = vpop.permute.xlu1 %299 }
 0x104   :  { %v1131_v2 = vpop.f32.mrf.mxu0 }
 0x106   :  { %v1133_v6 = vpop.f32.mrf.mxu0 }
 0x108   :  { %v1135_v7 = vpop.f32.mrf.mxu0 }
 0x109   :  { %v262_v22 = vpack.c.bf16 %v1135_v7, %v1131_v2  ;;  %v902_v7 = vld [vmem:[%s1208_s3 + $0x8] sm:$0xff]  }
 0x10a   :  { %v1137_v8 = vpop.f32.mrf.mxu0 }
 0x10c   :  { %v1139_v11 = vpop.f32.mrf.mxu0 }
 0x10e   :  { %v1141_v12 = vpop.f32.mrf.mxu0 }
 0x110   :  { %v1143_v13 = vpop.f32.mrf.mxu0 }
 0x111   :  { %v264_v1 = vpack.c.bf16 %v1143_v13, %v1139_v11  ;;  %v778_v11 = vcombine.low %v320_v10, %v332_v9  ;;  %v308_v13 = vrot.slane %v300_v15, %v1150_v28 }
 0x112   :  { %v1145_v16 = vpop.f32.mrf.mxu0 }
 0x113   :  { %v528_v17 = vadd.bf16 %v780_v61, %v264_v1  ;;  %v263_v18 = vpack.c.bf16 %v1145_v16, %v1141_v12  ;;  %v526_v12 = vadd.bf16 %v778_v11, %v262_v22  ;;  %v261_v16 = vpack.c.bf16 %v1137_v8, %v1133_v6  ;;  %v651_v8 = vpop.permute.xlu1 %650 }
 0x114   :  { %v845_v20 = vpop.f32.mrf.mxu0  ;;  %v909_v6 = vmov 0.0   ;;  %v659_v35 = vrot.slane %v651_v8, %v1150_v28 }
 0x115   :  { %v527_v24 = vadd.bf16 %v779_v14, %v263_v18  ;;  %v536_v25 = vmax.bf16 %v907_v3, %v528_v17  ;;  %v534_v30 = vmax.bf16 %v907_v3, %v526_v12 }
 0x116   :  { %v230_v21 = vpop.f32.mrf.mxu0 }
 0x117   :  { %v627_v32 = vpop.permute.xlu1 %626 }
 0x118   :  { %v846_v26 = vpop.f32.mrf.mxu0 }
 0x119   :  { %v266_v48 = vpack.c.bf16 %v846_v26, %v845_v20  ;;  %v288_v20 = vpop.permute.xlu0 %287 }
 0x11a   :  { %v233_v27 = vpop.f32.mrf.mxu0 }
 0x11b   :  { %v530_v57 = vadd.bf16 %v782_v43, %v266_v48  ;;  %v265_v58 = vpack.c.bf16 %v233_v27, %v230_v21  ;;  %v296_v21 = vrot.slane %v288_v20, %v1150_v28  ;;  %v535_v27 = vmax.bf16 %v907_v3, %v527_v24  ;;  %v731_v55 = vpop.permute.xlu1 %730 }
 0x11c   :  { %v849_v29 = vpop.f32.mrf.mxu0 }
 0x11d   :  { %v529_v4 = vadd.bf16 %v781_v56, %v265_v58  ;;  %v538_v5 = vmax.bf16 %v907_v3, %v530_v57  ;;  %v777_v26 = vcombine.low %v296_v21, %v308_v13  ;;  %v639_v31 = vpop.permute.xlu0 %638 }
 0x11e   :  { %v246_v38 = vpop.f32.mrf.mxu0  ;;  %v647_v34 = vrot.slane %v639_v31, %v1150_v28 }
 0x11f   :  { %v537_v19 = vmax.bf16 %v907_v3, %v529_v4 }
 0x120   :  { %v850_v39 = vpop.f32.mrf.mxu0 }
 0x121   :  { %v268_v41 = vpack.c.bf16 %v850_v39, %v849_v29  ;;  %v525_v29 = vadd.bf16 %v777_v26, %v261_v16  ;;  %v615_v36 = vpop.permute.xlu0 %614  ;;  %v635_v39 = vrot.slane %v627_v32, %v1150_v28 }
 0x122   :  { %v249_v45 = vpop.f32.mrf.mxu0 }
 0x123   :  { %v532_v49 = vadd.bf16 %v784_v40, %v268_v41  ;;  %v267_v50 = vpack.c.bf16 %v249_v45, %v246_v38  ;;  %v533_v2 = vmax.bf16 %v907_v3, %v525_v29  ;;  %v623_v38 = vrot.slane %v615_v36, %v1150_v28 }
 0x124   :  { %v788_v41 = vcombine.low %v647_v34, %v659_v35 }
 0x125   :  { %v531_v52 = vadd.bf16 %v783_v42, %v267_v50  ;;  %v540_v53 = vmax.bf16 %v907_v3, %v532_v49  ;;  %v787_v44 = vcombine.low %v623_v38, %v635_v39  ;;  %v676_v50 = vld [vmem:[%s1209_s5] sm:$0xf]  ;;  %v681_v28 = vpop.permute.xlu0 %680 }
 0x127   :  { %851 = vmatprep.subr.bf16.mxu1 %v540_v53  ;;  %v539_v59 = vmax.bf16 %v907_v3, %v531_v52 }
 0x128   :  { %852 = vmatpush3.bf16.msra.mxu1 %v540_v53 }
 0x129   :  { %853 = vmatprep.subr.bf16.mxu1 %v539_v59  ;;  %v744_v63 = vpop.permute.xlu0 %743 }
 0x12c   :  { %854 = vmatpush3.bf16.msra.mxu1 %v539_v59 }
 0x12d   :  { %855 = vmatprep.subr.bf16.mxu1 %v538_v5 }
 0x130   :  { %856 = vmatpush3.bf16.msra.mxu1 %v538_v5 }
 0x131   :  { %857 = vmatprep.subr.bf16.mxu1 %v537_v19 }
 0x134   :  { %858 = vmatpush3.bf16.msra.mxu1 %v537_v19 }
 0x135   :  { %859 = vmatprep.subr.bf16.mxu1 %v536_v25 }
 0x138   :  { %860 = vmatpush3.bf16.msra.mxu1 %v536_v25 }
 0x139   :  { %861 = vmatprep.subr.bf16.mxu1 %v535_v27 }
 0x13c   :  { %862 = vmatpush3.bf16.msra.mxu1 %v535_v27 }
 0x13d   :  { %863 = vmatprep.subr.bf16.mxu1 %v534_v30 }
 0x140   :  { %864 = vmatpush3.bf16.msra.mxu1 %v534_v30 }
 0x141   :  { %865 = vmatprep.subr.bf16.mxu1 %v533_v2 }
 0x144   :  { %866 = vmatpush3.bf16.msra.mxu1 %v533_v2 }
 0x145   :  { %871 = vmatprep.subr.bf16.mxu1 %v909_v6 }
 0x147   :  { %868 = vmatmul.mubr.bf16.vlgmr.msra.gmra.mxu1 %v902_v7 }
 0x148   :  { %875 = vmatprep.mubr.msk.bf16.mxu1 %vm910_vm1, %v909_v6 }
 0x207   :  { %v869_v33 = vpop.f32.mrf.mxu1 }
 0x209   :  { %v591_v37 = vpop.f32.mrf.mxu1 }
 0x20b   :  { %v870_v40 = vpop.f32.mrf.mxu1 }
 0x20c   :  { %v607_v42 = vpack.c.bf16 %v870_v40, %v869_v33 }
 0x20d   :  { %v594_v43 = vpop.f32.mrf.mxu1 }
 0x20e   :  { %v673_v45 = vadd.bf16 %v788_v41, %v607_v42  ;;  %v606_v46 = vpack.c.bf16 %v594_v43, %v591_v37 }
 0x210   :  { %v675_v47 = vmax.bf16 %v907_v3, %v673_v45  ;;  %v672_v48 = vadd.bf16 %v787_v44, %v606_v46 }
 0x212   :  { %872 = vmatpush3.bf16.msra.mxu1 %v675_v47  ;;  %v674_v49 = vmax.bf16 %v907_v3, %v672_v48  ;;  %v748_v3 = vsub.s32 0, %v1147_v23 }
 0x213   :  { %873 = vmatprep.subr.bf16.mxu1 %v909_v6 }
 0x214   :  { %v749_v1 = vrot.slane %v744_v63, %v748_v3 }
 0x216   :  { %874 = vmatpush3.bf16.msra.mxu1 %v674_v49 }
 0x219   :  { %876 = vmatmul.mubr.msk.bf16.vlgmr.msra.gmra.mxu1 %vm115_vm0, %v676_v50 }
 0x2d9   :  { %v720_v51 = vpop.f32.mrf.mxu1 }
 0x2da   :  { %v721_v52 = vadd.f32 %v720_v51, %v681_v28 }
 0x2db   :  { %v877_v53 = vpop.f32.mrf.mxu1 }
 0x2dc   :  { %v726_v54 = vmax.f32 %v721_v52, 0.0 }
 0x2dd   :  { %v723_v56 = vpop.f32.mrf.mxu1 }
 0x2de   :  { %v733_v57 = vmul.f32 %v731_v55, %v726_v54 }
 0x2df   :  { %v878_v58 = vpop.f32.mrf.mxu1 }
 0x2e0   :  { %v734_v59 = vrot.slane %v733_v57, 4 }
 0x2e2   :  { %v735_v60 = vadd.f32 %v734_v59, %v733_v57 }
 0x2e4   :  { %v736_v61 = vrot.slane %v735_v60, 2 }
 0x2e6   :  { %v737_v62 = vadd.f32 %v736_v61, %v735_v60 }
 0x2e8   :  { %v738_v0 = vrot.slane %v737_v62, 1 }
 0x2ea   :  { %v739_v4 = vadd.f32 %v738_v0, %v737_v62 }
 0x2ec   :  { %v750_v5 = vadd.f32 %v749_v1, %v739_v4 }
 0x2ee   :  { %v751_v9 = vsub.f32 0.0, %v750_v5 }
 0x2f0   :  { %v752_v10 = vmul.f32 1.442695, %v751_v9 }
 0x2f2   :  { %903 = vpow2.f32 %v752_v10 }
 0x2ff   :  { %v904_v14 = vpop.eup %903 }
 0x300   :  { %v754_v15 = vadd.f32 1.0, %v904_v14 }
 0x302   :  { %905 = vrcp.f32 %v754_v15 }
 0x30f   :  { %v906_v17 = vpop.eup %905 }
 0x310   :  { %756 = vst [vmem:[%s1210_s9] sm:$0x1] %v906_v17 }

</bundles_post_ra>
